<compile_context>
chip_gen: v5e
topology: v5e:2x2
jax: 0.10.0
libtpu: 0.0.40
codegen_flags: <defaults>
</compile_context>

<pallas_src>
import functools

import jax
import jax.numpy as jnp
from jax import lax
from jax.experimental import pallas as pl
from jax.experimental.pallas import tpu as pltpu


_TARGET_BLOCK_ELEMS = 512 * 1024   # ~2 MiB of f32 per input block


def _bce_elementwise(x, t):
    """Numerically stable BCE-with-logits, element-wise, in f32."""
    x = x.astype(jnp.float32)
    t = t.astype(jnp.float32)
    return jnp.maximum(x, 0.0) - x * t + jnp.log1p(jnp.exp(-jnp.abs(x)))


def _bce_partial_kernel(x_ref, t_ref, o_ref, *, rows, row_tile, lanes, ragged):
    """One grid tile: partial BCE sum folded to an owned (8, 128) f32 block."""
    num_strips = row_tile // 8

    if ragged:
        # Only the last tile is actually ragged; for the others valid_rows >= row_tile
        # and the mask is all-true (2 cheap VPU ops per strip, negligible).
        valid_rows = rows - pl.program_id(0) * row_tile
        row_iota = lax.broadcasted_iota(jnp.int32, (8, lanes), 0)   # hoisted

    def strip(r, acc):
        r8 = pl.multiple_of(r * 8, 8)
        x = x_ref[pl.ds(r8, 8), :].astype(jnp.float32)
        t = t_ref[pl.ds(r8, 8), :].astype(jnp.float32)   # in-kernel cast (bf16/int8 ok)
        per = jnp.maximum(x, 0.0) - x * t + jnp.log1p(jnp.exp(-jnp.abs(x)))
        if ragged:
            per = jnp.where(row_iota + r8 < valid_rows, per, 0.0)
        return acc + per

    # Strip-wise accumulation: ~10-20 live vregs instead of a 256-vreg per_elem blob.
    acc = lax.fori_loop(0, num_strips, strip,
                        jnp.zeros((8, lanes), jnp.float32),
                        unroll=min(4, num_strips))

    # Fold the lane axis down to 128 once, with static 128-aligned slices (VPU adds).
    out = acc[:, 0:128]
    for j in range(1, lanes // 128):
        out = out + acc[:, j * 128:(j + 1) * 128]

    # Each grid tile owns its own (8, 128) output block -> no cross-step dependency.
    o_ref[...] = out


def seg_loss(mask, target, *, min_kernel_elements=1 << 20):
    """BCE-with-logits mean loss (== SegLoss.forward with a dense target).

    `mask` is the mask-head logits; `target` is the same-shape dense mask tensor
    (any float dtype, or bf16/int8 {0,1} masks straight from the data pipeline —
    it is cast to f32 inside the kernel, so no wrapper-side conversion pass).
    """
    assert mask.shape == target.shape
    total = int(mask.size)

    x_flat = mask.reshape(-1)                       # contiguous flatten: free
    t_flat = target.reshape(-1)                     # keep caller dtype; cast in-kernel
    if t_flat.dtype == jnp.bool_:
        t_flat = t_flat.astype(jnp.float32)         # conservative: avoid i1 refs

    # Launch/overhead-dominated inputs (real mask-head shapes are a few K elems):
    # plain XLA is faster than paying kernel dispatch + plumbing.
    if total < max(int(min_kernel_elements), 1024):
        return jnp.sum(_bce_elementwise(x_flat, t_flat)) / float(total)

    # --- choose a lane-dense 2-D view -------------------------------------------
    # Prefer a lane count that DIVIDES total so the reshape is free (no data
    # movement at all); otherwise take the widest one giving >= 8 full rows and
    # handle the < lanes element tail in plain XLA.
    lanes = None
    for cand in (512, 256, 128):
        if total % cand == 0 and total // cand >= 8:
            lanes = cand
            break
    if lanes is None:
        for cand in (512, 256, 128):
            if total // cand >= 8:
                lanes = cand
                break

    rows = total // lanes
    main_len = rows * lanes
    tail = total - main_len

    # ~2 MiB f32 per input block; double-buffered x2 inputs <= 8 MiB scoped VMEM
    # (inside v5e's 16 MiB default, far inside v6e/v7x's 32 MiB).
    row_tile = max(8, (_TARGET_BLOCK_ELEMS // lanes) // 8 * 8)
    # Keep the grid >= 2 tiles when possible so both TensorCores (v7x) get work.
    if rows < 2 * row_tile:
        row_tile = max(8, ((rows + 1) // 2 + 7) // 8 * 8)
    num_tiles = -(-rows // row_tile)                # ceil
    ragged = (rows % row_tile) != 0

    if tail:
        # Whole-lane prefix only (feedback-endorsed path). The prefix slice is the
        # only copy we ever pay, and only when total % 128 != 0.
        x_main = x_flat[:main_len]
        t_main = t_flat[:main_len]
    else:
        x_main = x_flat                             # free reshape, no copies
        t_main = t_flat
    x2d = x_main.reshape(rows, lanes)
    t2d = t_main.reshape(rows, lanes)

    kernel = functools.partial(_bce_partial_kernel, rows=rows, row_tile=row_tile,
                               lanes=lanes, ragged=ragged)

    bytes_accessed = (main_len * x2d.dtype.itemsize
                      + main_len * t2d.dtype.itemsize
                      + num_tiles * 8 * 128 * 4)
    cost = pl.CostEstimate(flops=8 * main_len,
                           transcendentals=2 * main_len,
                           bytes_accessed=bytes_accessed)

    partials = pl.pallas_call(
        kernel,
        out_shape=jax.ShapeDtypeStruct((num_tiles * 8, 128), jnp.float32),
        grid_spec=pltpu.PrefetchScalarGridSpec(
            num_scalar_prefetch=0,
            grid=(num_tiles,),
            in_specs=[
                pl.BlockSpec((row_tile, lanes), lambda i: (i, 0)),
                pl.BlockSpec((row_tile, lanes), lambda i: (i, 0)),
            ],
            out_specs=pl.BlockSpec((8, 128), lambda i: (i, 0)),
        ),
        compiler_params=pltpu.CompilerParams(
            # Each tile is independent (owns its output block) -> megacore can split.
            dimension_semantics=("parallel",),
        ),
        cost_estimate=cost,
    )(x2d, t2d)

    loss_sum = jnp.sum(partials)
    if tail:
        loss_sum = loss_sum + jnp.sum(
            _bce_elementwise(x_flat[main_len:], t_flat[main_len:]))

    # Mean over the TRUE element count.
    return loss_sum / float(total)


def seg_loss_ref(mask, target):
    return jnp.mean(_bce_elementwise(mask, target))


if __name__ == "__main__":
    key = jax.random.PRNGKey(0)
    k1, k2, k3, k4 = jax.random.split(key, 4)

    # Force the kernel path regardless of size; and the default (auto-bypass) path.
    seg_loss_kernel = jax.jit(functools.partial(seg_loss, min_kernel_elements=0))
    seg_loss_auto = jax.jit(seg_loss)

    # --- Test A: small NCHW shape consistent with a Mask R-CNN mask head --------
    # total = 1568 -> lanes=128, ragged last tile, 32-element XLA tail.
    N, C, H, W = 2, 1, 28, 28
    mask_logits = jax.random.normal(k1, (N, C, H, W), dtype=jnp.float32)
    target_f32 = (jax.random.uniform(k2, (N, C, H, W)) > 0.5).astype(jnp.float32)

    out_a = jax.block_until_ready(seg_loss_kernel(mask_logits, target_f32))
    ref_a = jax.block_until_ready(seg_loss_ref(mask_logits, target_f32))
    assert jnp.allclose(out_a, ref_a, rtol=1e-5, atol=1e-6), (out_a, ref_a)

    # --- Test B: larger lane-aligned input (2-tile parallel grid, no tail) ------
    N2, C2, H2, W2 = 8, 1, 256, 256
    mask2 = jax.random.normal(k3, (N2, C2, H2, W2), dtype=jnp.float32)
    target2_f32 = (jax.random.uniform(k4, (N2, C2, H2, W2)) > 0.5).astype(jnp.float32)

    out_b = jax.block_until_ready(seg_loss_kernel(mask2, target2_f32))
    ref_b = jax.block_until_ready(seg_loss_ref(mask2, target2_f32))
    assert jnp.allclose(out_b, ref_b, rtol=1e-4, atol=1e-6), (out_b, ref_b)

    # --- Test C: sub-32-bit target streaming (bf16 binary masks, cast in-kernel) -
    target2_bf16 = target2_f32.astype(jnp.bfloat16)            # exact for {0,1}
    out_c = jax.block_until_ready(seg_loss_kernel(mask2, target2_bf16))
    assert jnp.allclose(out_c, ref_b, rtol=1e-4, atol=1e-6), (out_c, ref_b)

    # --- Test D: default small-input bypass (plain-XLA path) --------------------
    out_d = jax.block_until_ready(seg_loss_auto(mask_logits, target_f32))
    assert jnp.allclose(out_d, ref_a, rtol=1e-5, atol=1e-6), (out_d, ref_a)

    print("KERNEL_OK")
</pallas_src>

<mosaic_0001>
module attributes {stable_mosaic.version = 11 : i64} {
  func.func @_bce_partial_kernel(%arg0: i32, %arg1: memref<8x128xf32, #tpu.memory_space<vmem>>, %arg2: memref<8x128xf32, #tpu.memory_space<vmem>>, %arg3: memref<8x128xf32, #tpu.memory_space<vmem>>) attributes {dimension_semantics = [#tpu.dimension_semantics<parallel>], iteration_bounds = array<i64: 2>, scalar_prefetch = 0 : i64, scratch_operands = 0 : i64, tpu.core_type = #tpu.core_type<tc>, window_params = [{transform_indices = @transform_0, window_bounds = array<i64: 8, 128>}, {transform_indices = @transform_1, window_bounds = array<i64: 8, 128>}, {transform_indices = @transform_2, window_bounds = array<i64: 8, 128>}]} {
    %c8_i32 = arith.constant 8 : i32
    %0 = arith.muli %arg0, %c8_i32 : i32
    %c12_i32 = arith.constant 12 : i32
    %1 = arith.subi %c12_i32, %0 : i32
    %2 = tpu.iota {dimensions = array<i32: 0>} : vector<8x128xi32>
    %cst = arith.constant 0.000000e+00 : f32
    %3 = vector.broadcast %cst : f32 to vector<8x128xf32>
    %c0_i32 = arith.constant 0 : i32
    %c8_i32_0 = arith.constant 8 : i32
    %4 = arith.muli %c0_i32, %c8_i32_0 : i32
    %5 = tpu.assume_multiple %4, 8 : i32
    %6 = arith.index_cast %5 : i32 to index
    %c0 = arith.constant 0 : index
    %7 = vector.load %arg1[%6, %c0] : memref<8x128xf32, #tpu.memory_space<vmem>>, vector<8x128xf32>
    %8 = arith.index_cast %5 : i32 to index
    %c0_1 = arith.constant 0 : index
    %9 = vector.load %arg2[%8, %c0_1] : memref<8x128xf32, #tpu.memory_space<vmem>>, vector<8x128xf32>
    %cst_2 = arith.constant 0.000000e+00 : f32
    %10 = vector.broadcast %cst_2 : f32 to vector<8x128xf32>
    %11 = arith.maximumf %7, %10 : vector<8x128xf32>
    %12 = arith.mulf %7, %9 : vector<8x128xf32>
    %13 = arith.subf %11, %12 : vector<8x128xf32>
    %14 = math.absf %7 : vector<8x128xf32>
    %cst_3 = arith.constant 0.000000e+00 : f32
    %15 = vector.broadcast %cst_3 : f32 to vector<8x128xf32>
    %16 = arith.subf %15, %14 : vector<8x128xf32>
    %17 = math.exp %16 : vector<8x128xf32>
    %18 = math.log1p %17 : vector<8x128xf32>
    %19 = arith.addf %13, %18 : vector<8x128xf32>
    %20 = vector.broadcast %5 : i32 to vector<8x128xi32>
    %21 = arith.addi %2, %20 : vector<8x128xi32>
    %22 = vector.broadcast %1 : i32 to vector<8x128xi32>
    %23 = arith.cmpi slt, %21, %22 : vector<8x128xi32>
    %cst_4 = arith.constant 0.000000e+00 : f32
    %24 = vector.broadcast %cst_4 : f32 to vector<8x128xf32>
    %25 = arith.select %23, %19, %24 : vector<8x128xi1>, vector<8x128xf32>
    %26 = arith.addf %3, %25 : vector<8x128xf32>
    %c1_i32 = arith.constant 1 : i32
    %c0_5 = arith.constant 0 : index
    %c0_6 = arith.constant 0 : index
    %27 = vector.load %arg3[%c0_5, %c0_6] : memref<8x128xf32, #tpu.memory_space<vmem>>, vector<8x128xf32>
    tpu.vector_store %arg3[%c0_5, %c0_6], %26 {strides = array<i32>} : memref<8x128xf32, #tpu.memory_space<vmem>>, vector<8x128xf32>,
    return
  }
  func.func @transform_0(%arg0: i32) -> (i32, i32) {
    %c0_i32 = arith.constant 0 : i32
    %c0_i32_0 = arith.constant 0 : i32
    return %arg0, %c0_i32 : i32, i32
  }
  func.func @transform_1(%arg0: i32) -> (i32, i32) {
    %c0_i32 = arith.constant 0 : i32
    %c0_i32_0 = arith.constant 0 : i32
    return %arg0, %c0_i32 : i32, i32
  }
  func.func @transform_2(%arg0: i32) -> (i32, i32) {
    %c0_i32 = arith.constant 0 : i32
    %c0_i32_0 = arith.constant 0 : i32
    return %arg0, %c0_i32 : i32, i32
  }
}

</mosaic_0001>

<bundles_post_ra>
// kernel: seg_loss.1
= control target key start
LH: loop header
LB: loop body
LE: loop exit
PB: predicated region body
PF: predicated region fallthrough
CT: control target
= control target key end

     0   :  { %s297_s9 = smov 0   ;;  %s322_s0 = inlined_call_operand.vmem [shape: f32[12,128], index: 0, kind: input, shape index: {}]   ;;  %s323_s1 = inlined_call_operand.vmem [shape: f32[12,128], index: 1, kind: input, shape index: {}]   ;;  %s324_s2 = inlined_call_operand.vmem [shape: f32[16,128], index: 2, kind: output, shape index: {}]  }
   0x1 LB: > { %s251_s10 = sadd.s32 4294967295, %s280_s9   ;;  %p255_p0 = scmp.ge.s32.totalorder %s280_s9, 1  ;;  %s280_s9 = sphi %s297_s9, %s12_s9  }
   0x2   : > { %p120_p1 = scmp.lt.s32.totalorder %s280_s9, 3 }
   0x4   : > { %p121_p2 = pnand %p255_p0, %p120_p1 }
   0x5   : > { %p144_p3 = scmp.lt.s32.totalorder (!%p121_p2), %s251_s10, 1  ;;  %s259_s19 = sshll.u32 (!%p121_p2), %s251_s10, 3 }
   0x6   : > { %124 = sbr.rel (%p121_p2) target bundleno = 45 (0x2d), region = 28  ;;  %s157_s20 = ssub.s32 (!%p121_p2), 12, %s259_s19 }
   0xb   : > { %s145_s11 = scalar_select %p144_p3, %s251_s10, 1  ;;  %v158_v8 = vlaneseq  ;;  %v181_v17 = vstv %s157_s20 }
   0xd   : > { %s305_s12 = sshll.u32 %s145_s11, 3  ;;  %v159_v13 = vshrl.u32 %v158_v8, 7 }
   0xe   : > { %s147_s15 = scalar_lea.vmem %s322_s0, %s305_s12  ;;  %s151_s18 = scalar_lea.vmem %s323_s1, %s305_s12 }
   0xf   : > { %v160_v0 = vld [vmem:[%s147_s15] sm:$0xff]  ;;  %vm182_vm1 = vcmp.lt.s32.totalorder %v159_v13, %v181_v17  ;;  %s155_s23 = scalar_lea.vmem %s324_s2, %s305_s12 }
  0x10   : > { %v165_v1 = vand.u32 2147483647, %v160_v0  ;;  %v161_v7 = vld [vmem:[%s151_s18] sm:$0xff]  ;;  %v162_v10 = vmax.f32 %v160_v0, 0.0 }
  0x11   : > { %v163_v11 = vmul.f32 %v161_v7, %v160_v0 }
  0x12   : > { %v166_v2 = vsub.f32 0.0, %v165_v1 }
  0x13   : > { %v164_v16 = vsub.f32 %v162_v10, %v163_v11 }
  0x14   : > { %v167_v3 = vmul.f32 1.442695, %v166_v2 }
  0x16   : > { %270 = vpow2.f32 %v167_v3 }
  0x1c   : > { %v271_v4 = vpop.eup %270 }
  0x1d   : > { %v169_v5 = vadd.f32 1.0, %v271_v4  ;;  %v172_v6 = vmul.f32 -0.5, %v271_v4  ;;  %v175_v12 = vand.u32 2147483647, %v271_v4 }
  0x1f   : > { %272 = vlog2.f32 %v169_v5  ;;  %v173_v9 = vadd.f32 1.0, %v172_v6  ;;  %vm176_vm0 = vcmp.lt.f32.partialorder %v175_v12, 0.0004427343 }
  0x21   : > { %v174_v14 = vmul.f32 %v271_v4, %v173_v9 }
  0x25   : > { %v273_v15 = vpop.eup %272 }
  0x26   : > { %v171_v18 = vmul.f32 0.6931472, %v273_v15 }
  0x28   : > { %v177_v19 = vsel %vm176_vm0, %v174_v14, %v171_v18 }
  0x29   : > { %v178_v20 = vadd.f32 %v177_v19, %v164_v16 }
  0x2b   : > { %v183_v21 = vsel %vm182_vm1, %v178_v20, 0.0 }
  0x2c   : > { %185 = vst [vmem:[%s155_s23] sm:$0xff] %v183_v21 }
  0x2d PF: > { %s12_s9 = sadd.s32 1, %s280_s9  }
  0x2e   : > { %p9_p4 = scmp.ge.s32.totalorder %s12_s9, 4  }
  0x30   :  { %11 = sbr.rel (!%p9_p4) target bundleno = 1 (0x1), region = 61 }

</bundles_post_ra>
